<compile_context>
chip_gen: v7x
topology: tpu7x:2x2x1
jax: 0.10.0
libtpu: 0.0.40
codegen_flags: <defaults>
</compile_context>

<pallas_src>
import jax
import jax.numpy as jnp
from jax.experimental import pallas as pl
from jax.experimental.pallas import tpu as pltpu

STATE_SIZE = 29
EMBED_DIM = 128
VEC_ROWS = 8          # packed small-vector tile: rows = [b_big, b1, b2, gamma, beta, 0, 0, 0]
LN_EPS = 1e-5         # PyTorch nn.LayerNorm default
DEFAULT_BLOCK_B = 8192


def _round_up(x, m):
    return (x + m - 1) // m * m


def _encoder_kernel(state_ref, wbig_ref, w1_ref, w2_ref, vec_ref, out_ref):
    """One batch tile: fused sub-encoders -> combiner MLP -> LayerNorm."""
    x = state_ref[...].astype(jnp.bfloat16)        # (TB, 29), cast in-kernel

    b_big = vec_ref[0:1, :]                        # (1, 128) f32
    b1    = vec_ref[1:2, :]
    b2    = vec_ref[2:3, :]
    gamma = vec_ref[3:4, :]
    beta  = vec_ref[4:5, :]

    # Six sub-encoders + ReLU + concat, fused into one block-structured matmul
    # (contraction directly over K=29; Mosaic handles the unaligned K).
    h = jnp.dot(x, wbig_ref[...], preferred_element_type=jnp.float32) + b_big
    h = jnp.maximum(h, 0.0)

    # feature_combiner: Linear -> ReLU -> Dropout(identity at eval) -> Linear
    h = jnp.dot(h.astype(jnp.bfloat16), w1_ref[...],
                preferred_element_type=jnp.float32) + b1
    h = jnp.maximum(h, 0.0)
    h = jnp.dot(h.astype(jnp.bfloat16), w2_ref[...],
                preferred_element_type=jnp.float32) + b2

    # LayerNorm over the embed dimension (f32 statistics).
    mean = jnp.mean(h, axis=-1, keepdims=True)
    centered = h - mean
    var = jnp.mean(centered * centered, axis=-1, keepdims=True)
    normed = centered * jax.lax.rsqrt(var + LN_EPS)
    out_ref[...] = (normed * gamma + beta).astype(out_ref.dtype)


def pack_params(params):
    """Repack logical params into kernel-ready bf16 weights + one packed f32 tile."""
    vec = jnp.zeros((VEC_ROWS, EMBED_DIM), jnp.float32)
    vec = vec.at[0].set(params["b_big"].reshape(EMBED_DIM))
    vec = vec.at[1].set(params["b1"].reshape(EMBED_DIM))
    vec = vec.at[2].set(params["b2"].reshape(EMBED_DIM))
    vec = vec.at[3].set(params["gamma"].reshape(EMBED_DIM))
    vec = vec.at[4].set(params["beta"].reshape(EMBED_DIM))
    return {
        "w_big": params["w_big"].astype(jnp.bfloat16),   # (29, 128)
        "w1": params["w1"].astype(jnp.bfloat16),         # (128, 128)
        "w2": params["w2"].astype(jnp.bfloat16),         # (128, 128)
        "vec": vec,                                      # (8, 128) f32
    }


def _choose_tile_rows(B, block_b):
    """Pick the batch-tile row count (bounded padding waste, >= 2 tiles for big B)."""
    if B <= 8:
        return B                                   # single block == full (tiny) batch
    num_tiles = pl.cdiv(B, block_b)
    if B >= 2048:
        num_tiles = max(num_tiles, 2)              # v7x: let both TensorCores work
    tb = _round_up(pl.cdiv(B, num_tiles), 16)      # 16-row alignment for bf16 packing
    tb = min(tb, (B // 8) * 8)                     # multiple of 8, never larger than B
    return tb


def enhanced_robot_encoder(state, params, *, block_b=DEFAULT_BLOCK_B,
                           out_dtype=jnp.float32):
    """state: (B, 29) float32 -> (B, 128) out_dtype (float32 matches PyTorch)."""
    if state.ndim == 1:
        state = state[None, :]
    assert state.shape[1] == STATE_SIZE
    B = state.shape[0]

    packed = pack_params(params)

    tb = _choose_tile_rows(B, block_b)
    grid = pl.cdiv(B, tb)   # ragged last tile handled by Pallas OOB masking

    out = pl.pallas_call(
        _encoder_kernel,
        out_shape=jax.ShapeDtypeStruct((B, EMBED_DIM), out_dtype),
        grid=(grid,),
        in_specs=[
            pl.BlockSpec((tb, STATE_SIZE), lambda i: (i, 0)),             # streamed state tile (f32, no copy)
            pl.BlockSpec((STATE_SIZE, EMBED_DIM), lambda i: (0, 0)),      # resident fused encoder weight
            pl.BlockSpec((EMBED_DIM, EMBED_DIM), lambda i: (0, 0)),       # resident combiner W1
            pl.BlockSpec((EMBED_DIM, EMBED_DIM), lambda i: (0, 0)),       # resident combiner W2
            pl.BlockSpec((VEC_ROWS, EMBED_DIM), lambda i: (0, 0)),        # packed biases + LN params
        ],
        out_specs=pl.BlockSpec((tb, EMBED_DIM), lambda i: (i, 0)),
        compiler_params=pltpu.CompilerParams(
            dimension_semantics=("parallel",),
            vmem_limit_bytes=48 * 1024 * 1024,   # large tiles need > v5e/v6e scoped defaults
        ),
    )(state, packed["w_big"], packed["w1"], packed["w2"], packed["vec"])

    return out


def init_params(key):
    """Deterministic synthetic parameters (shapes match the PyTorch module)."""
    sub_specs = [
        ("joint",   4, 21),
        ("body",    6, 21),
        ("food",    4, 21),
        ("physics", 3, 16),
        ("action",  2, 16),
        ("ray",    10, 33),
    ]
    keys = jax.random.split(key, 2 * len(sub_specs) + 4)

    # Block-structured fused weight: state slices map to output chunks.
    w_big = jnp.zeros((STATE_SIZE, EMBED_DIM), jnp.float32)
    b_big = jnp.zeros((1, EMBED_DIM), jnp.float32)
    in_off, out_off = 0, 0
    for i, (_, din, dout) in enumerate(sub_specs):
        w = jax.random.normal(keys[2 * i], (din, dout), jnp.float32) * 0.1
        b = jax.random.normal(keys[2 * i + 1], (dout,), jnp.float32) * 0.01
        w_big = w_big.at[in_off:in_off + din, out_off:out_off + dout].set(w)
        b_big = b_big.at[0, out_off:out_off + dout].set(b)
        in_off += din
        out_off += dout
    assert in_off == STATE_SIZE and out_off == EMBED_DIM

    k_w1, k_w2, k_b1, k_b2 = keys[-4:]
    return {
        "w_big": w_big,
        "b_big": b_big,
        "w1": jax.random.normal(k_w1, (EMBED_DIM, EMBED_DIM), jnp.float32) * 0.05,
        "b1": jax.random.normal(k_b1, (1, EMBED_DIM), jnp.float32) * 0.01,
        "w2": jax.random.normal(k_w2, (EMBED_DIM, EMBED_DIM), jnp.float32) * 0.05,
        "b2": jax.random.normal(k_b2, (1, EMBED_DIM), jnp.float32) * 0.01,
        "gamma": jnp.ones((1, EMBED_DIM), jnp.float32),
        "beta": jnp.zeros((1, EMBED_DIM), jnp.float32),
    }


def reference_forward_bf16(state, params):
    """Pure-JAX reference with the SAME bf16-input / f32-accumulate casts as the kernel."""
    x = state.astype(jnp.bfloat16)
    w_big = params["w_big"].astype(jnp.bfloat16)
    w1 = params["w1"].astype(jnp.bfloat16)
    w2 = params["w2"].astype(jnp.bfloat16)

    h = jnp.dot(x, w_big, preferred_element_type=jnp.float32) + params["b_big"]
    h = jnp.maximum(h, 0.0)
    h = jnp.dot(h.astype(jnp.bfloat16), w1, preferred_element_type=jnp.float32) + params["b1"]
    h = jnp.maximum(h, 0.0)
    h = jnp.dot(h.astype(jnp.bfloat16), w2, preferred_element_type=jnp.float32) + params["b2"]
    mean = jnp.mean(h, axis=-1, keepdims=True)
    var = jnp.mean((h - mean) ** 2, axis=-1, keepdims=True)
    return (h - mean) * jax.lax.rsqrt(var + LN_EPS) * params["gamma"] + params["beta"]


def reference_forward_f32(state, params):
    """Full-precision reference (matches PyTorch eval-mode math exactly)."""
    h = jnp.maximum(state @ params["w_big"] + params["b_big"], 0.0)
    h = jnp.maximum(h @ params["w1"] + params["b1"], 0.0)
    h = h @ params["w2"] + params["b2"]
    mean = jnp.mean(h, axis=-1, keepdims=True)
    var = jnp.mean((h - mean) ** 2, axis=-1, keepdims=True)
    return (h - mean) * jax.lax.rsqrt(var + LN_EPS) * params["gamma"] + params["beta"]


if __name__ == "__main__":
    key = jax.random.PRNGKey(0)
    k_state, k_params = jax.random.split(key)

    B = 8
    state = jax.random.normal(k_state, (B, STATE_SIZE), jnp.float32)
    params = init_params(k_params)

    # TODO(synk): the PyTorch NaN/Inf input validation (raises ValueError) is a
    # host-side check and is not replicated inside the kernel.
    out = enhanced_robot_encoder(state, params)
    out = jax.block_until_ready(out)
    assert out.shape == (B, EMBED_DIM)

    # Exact-path check (same bf16 casts as the kernel) -- tight tolerance.
    ref_bf16 = reference_forward_bf16(state, params)
    assert jnp.allclose(out, ref_bf16, atol=2e-3, rtol=2e-3), "mismatch vs bf16-cast reference"

    # Sanity check against the full-f32 PyTorch-equivalent math -- loose
    # tolerance covering bf16 quantization only.
    ref_f32 = reference_forward_f32(state, params)
    assert jnp.allclose(out, ref_f32, atol=5e-2, rtol=5e-2), "mismatch vs f32 reference"

    # Exercise a ragged, multi-tile batch path as well (partial last block).
    B2 = 37
    state2 = jax.random.normal(k_state, (B2, STATE_SIZE), jnp.float32)
    out2 = jax.block_until_ready(enhanced_robot_encoder(state2, params, block_b=16))
    ref2 = reference_forward_bf16(state2, params)
    assert out2.shape == (B2, EMBED_DIM)
    assert jnp.allclose(out2, ref2, atol=2e-3, rtol=2e-3), "ragged-batch mismatch"

    print("KERNEL_OK")
</pallas_src>

<mosaic_0001>
module attributes {stable_mosaic.version = 11 : i64} {
  func.func @_encoder_kernel(%arg0: i32, %arg1: memref<8x29xf32, #tpu.memory_space<vmem>>, %arg2: memref<29x128xbf16, #tpu.memory_space<vmem>>, %arg3: memref<128x128xbf16, #tpu.memory_space<vmem>>, %arg4: memref<128x128xbf16, #tpu.memory_space<vmem>>, %arg5: memref<8x128xf32, #tpu.memory_space<vmem>>, %arg6: memref<8x128xf32, #tpu.memory_space<vmem>>) attributes {dimension_semantics = [#tpu.dimension_semantics<parallel>], iteration_bounds = array<i64: 1>, scalar_prefetch = 0 : i64, scratch_operands = 0 : i64, tpu.core_type = #tpu.core_type<tc>, window_params = [{transform_indices = @transform_0, window_bounds = array<i64: 8, 29>}, {pipeline_mode = #tpu.pipeline_mode<synchronous>, transform_indices = @transform_1, window_bounds = array<i64: 29, 128>}, {pipeline_mode = #tpu.pipeline_mode<synchronous>, transform_indices = @transform_2, window_bounds = array<i64: 128, 128>}, {pipeline_mode = #tpu.pipeline_mode<synchronous>, transform_indices = @transform_3, window_bounds = array<i64: 128, 128>}, {pipeline_mode = #tpu.pipeline_mode<synchronous>, transform_indices = @transform_4, window_bounds = array<i64: 8, 128>}, {transform_indices = @transform_5, window_bounds = array<i64: 8, 128>}]} {
    %c0 = arith.constant 0 : index
    %c0_0 = arith.constant 0 : index
    %0 = vector.load %arg1[%c0, %c0_0] : memref<8x29xf32, #tpu.memory_space<vmem>>, vector<8x29xf32>
    %1 = arith.truncf %0 : vector<8x29xf32> to vector<8x29xbf16>
    %c0_1 = arith.constant 0 : index
    %c0_2 = arith.constant 0 : index
    %2 = vector.load %arg5[%c0_1, %c0_2] : memref<8x128xf32, #tpu.memory_space<vmem>>, vector<1x128xf32>
    %c1 = arith.constant 1 : index
    %c0_3 = arith.constant 0 : index
    %3 = vector.load %arg5[%c1, %c0_3] : memref<8x128xf32, #tpu.memory_space<vmem>>, vector<1x128xf32>
    %c2 = arith.constant 2 : index
    %c0_4 = arith.constant 0 : index
    %4 = vector.load %arg5[%c2, %c0_4] : memref<8x128xf32, #tpu.memory_space<vmem>>, vector<1x128xf32>
    %c3 = arith.constant 3 : index
    %c0_5 = arith.constant 0 : index
    %5 = vector.load %arg5[%c3, %c0_5] : memref<8x128xf32, #tpu.memory_space<vmem>>, vector<1x128xf32>
    %c4 = arith.constant 4 : index
    %c0_6 = arith.constant 0 : index
    %6 = vector.load %arg5[%c4, %c0_6] : memref<8x128xf32, #tpu.memory_space<vmem>>, vector<1x128xf32>
    %c0_7 = arith.constant 0 : index
    %c0_8 = arith.constant 0 : index
    %7 = vector.load %arg2[%c0_7, %c0_8] : memref<29x128xbf16, #tpu.memory_space<vmem>>, vector<29x128xbf16>
    %cst = arith.constant dense<0.000000e+00> : vector<8x128xf32>
    %8 = tpu.matmul %1, %7, %cst {dimension_numbers = #tpu.dot_dimension_numbers<[1], [0], [0], [1], [0, 0, 1, 1], [], []>} : vector<8x29xbf16>, vector<29x128xbf16>, vector<8x128xf32> -> vector<8x128xf32>
    %9 = vector.broadcast %2 : vector<1x128xf32> to vector<8x128xf32>
    %10 = arith.addf %8, %9 : vector<8x128xf32>
    %cst_9 = arith.constant 0.000000e+00 : f32
    %11 = vector.broadcast %cst_9 : f32 to vector<8x128xf32>
    %12 = arith.maximumf %10, %11 : vector<8x128xf32>
    %13 = arith.truncf %12 : vector<8x128xf32> to vector<8x128xbf16>
    %c0_10 = arith.constant 0 : index
    %c0_11 = arith.constant 0 : index
    %14 = vector.load %arg3[%c0_10, %c0_11] : memref<128x128xbf16, #tpu.memory_space<vmem>>, vector<128x128xbf16>
    %cst_12 = arith.constant dense<0.000000e+00> : vector<8x128xf32>
    %15 = tpu.matmul %13, %14, %cst_12 {dimension_numbers = #tpu.dot_dimension_numbers<[1], [0], [0], [1], [0, 0, 1, 1], [], []>} : vector<8x128xbf16>, vector<128x128xbf16>, vector<8x128xf32> -> vector<8x128xf32>
    %16 = vector.broadcast %3 : vector<1x128xf32> to vector<8x128xf32>
    %17 = arith.addf %15, %16 : vector<8x128xf32>
    %cst_13 = arith.constant 0.000000e+00 : f32
    %18 = vector.broadcast %cst_13 : f32 to vector<8x128xf32>
    %19 = arith.maximumf %17, %18 : vector<8x128xf32>
    %20 = arith.truncf %19 : vector<8x128xf32> to vector<8x128xbf16>
    %c0_14 = arith.constant 0 : index
    %c0_15 = arith.constant 0 : index
    %21 = vector.load %arg4[%c0_14, %c0_15] : memref<128x128xbf16, #tpu.memory_space<vmem>>, vector<128x128xbf16>
    %cst_16 = arith.constant dense<0.000000e+00> : vector<8x128xf32>
    %22 = tpu.matmul %20, %21, %cst_16 {dimension_numbers = #tpu.dot_dimension_numbers<[1], [0], [0], [1], [0, 0, 1, 1], [], []>} : vector<8x128xbf16>, vector<128x128xbf16>, vector<8x128xf32> -> vector<8x128xf32>
    %23 = vector.broadcast %4 : vector<1x128xf32> to vector<8x128xf32>
    %24 = arith.addf %22, %23 : vector<8x128xf32>
    %cst_17 = arith.constant dense<0.000000e+00> : vector<8xf32>
    %25 = vector.multi_reduction <add>, %24, %cst_17 [1] : vector<8x128xf32> to vector<8xf32>
    %26 = vector.shape_cast %25 : vector<8xf32> to vector<8x1xf32>
    %cst_18 = arith.constant 1.280000e+02 : f32
    %27 = vector.broadcast %cst_18 : f32 to vector<8x1xf32>
    %28 = arith.divf %26, %27 : vector<8x1xf32>
    %29 = vector.broadcast %28 : vector<8x1xf32> to vector<8x128xf32>
    %30 = arith.subf %24, %29 : vector<8x128xf32>
    %31 = arith.mulf %30, %30 : vector<8x128xf32>
    %cst_19 = arith.constant dense<0.000000e+00> : vector<8xf32>
    %32 = vector.multi_reduction <add>, %31, %cst_19 [1] : vector<8x128xf32> to vector<8xf32>
    %33 = vector.shape_cast %32 : vector<8xf32> to vector<8x1xf32>
    %cst_20 = arith.constant 1.280000e+02 : f32
    %34 = vector.broadcast %cst_20 : f32 to vector<8x1xf32>
    %35 = arith.divf %33, %34 : vector<8x1xf32>
    %cst_21 = arith.constant 9.99999974E-6 : f32
    %36 = vector.broadcast %cst_21 : f32 to vector<8x1xf32>
    %37 = arith.addf %35, %36 : vector<8x1xf32>
    %38 = math.rsqrt %37 : vector<8x1xf32>
    %39 = vector.broadcast %38 : vector<8x1xf32> to vector<8x128xf32>
    %40 = arith.mulf %30, %39 : vector<8x128xf32>
    %41 = vector.broadcast %5 : vector<1x128xf32> to vector<8x128xf32>
    %42 = arith.mulf %40, %41 : vector<8x128xf32>
    %43 = vector.broadcast %6 : vector<1x128xf32> to vector<8x128xf32>
    %44 = arith.addf %42, %43 : vector<8x128xf32>
    %c0_22 = arith.constant 0 : index
    %c0_23 = arith.constant 0 : index
    %45 = vector.load %arg6[%c0_22, %c0_23] : memref<8x128xf32, #tpu.memory_space<vmem>>, vector<8x128xf32>
    tpu.vector_store %arg6[%c0_22, %c0_23], %44 {strides = array<i32>} : memref<8x128xf32, #tpu.memory_space<vmem>>, vector<8x128xf32>,
    return
  }
  func.func @transform_0(%arg0: i32) -> (i32, i32) {
    %c0_i32 = arith.constant 0 : i32
    %c0_i32_0 = arith.constant 0 : i32
    return %arg0, %c0_i32 : i32, i32
  }
  func.func @transform_1(%arg0: i32) -> (i32, i32) {
    %c0_i32 = arith.constant 0 : i32
    %c0_i32_0 = arith.constant 0 : i32
    %c0_i32_1 = arith.constant 0 : i32
    return %c0_i32, %c0_i32_0 : i32, i32
  }
  func.func @transform_2(%arg0: i32) -> (i32, i32) {
    %c0_i32 = arith.constant 0 : i32
    %c0_i32_0 = arith.constant 0 : i32
    %c0_i32_1 = arith.constant 0 : i32
    return %c0_i32, %c0_i32_0 : i32, i32
  }
  func.func @transform_3(%arg0: i32) -> (i32, i32) {
    %c0_i32 = arith.constant 0 : i32
    %c0_i32_0 = arith.constant 0 : i32
    %c0_i32_1 = arith.constant 0 : i32
    return %c0_i32, %c0_i32_0 : i32, i32
  }
  func.func @transform_4(%arg0: i32) -> (i32, i32) {
    %c0_i32 = arith.constant 0 : i32
    %c0_i32_0 = arith.constant 0 : i32
    %c0_i32_1 = arith.constant 0 : i32
    return %c0_i32, %c0_i32_0 : i32, i32
  }
  func.func @transform_5(%arg0: i32) -> (i32, i32) {
    %c0_i32 = arith.constant 0 : i32
    %c0_i32_0 = arith.constant 0 : i32
    return %arg0, %c0_i32 : i32, i32
  }
}

</mosaic_0001>

<bundles_post_ra>
// kernel: tpu_custom_call.1
= control target key start
LH: loop header
LB: loop body
LE: loop exit
PB: predicated region body
PF: predicated region fallthrough
CT: control target
= control target key end

     0   :  { %10 = vsyncpa [#allocation3], 0  ;;  %s801_s0 = inlined_call_operand.hbm [shape: f32[8,29], index: 0, kind: input, shape index: {}]   ;;  %s802_s1 = inlined_call_operand.hbm [shape: bf16[29,128], index: 1, kind: input, shape index: {}]   ;;  %s803_s2 = inlined_call_operand.hbm [shape: bf16[128,128], index: 2, kind: input, shape index: {}]   ;;  %s804_s3 = inlined_call_operand.hbm [shape: bf16[128,128], index: 3, kind: input, shape index: {}]   ;;  %s805_s4 = inlined_call_operand.vmem [shape: f32[8,128], index: 4, kind: input, shape index: {}]   ;;  %s806_s5 = inlined_call_operand.hbm [shape: f32[8,128], index: 5, kind: output, shape index: {}]  }
   0x1   :  { %11 = vsyncpa [#allocation6], 0 }
   0x2   :  { %12 = vsyncpa [#allocation9], 0 }
   0x3   :  { %13 = vsyncpa [#allocation4], 0  ;;  %s653_s18 = smov [#allocation5]   ;;  %s535_s22 = scalar_lea.hbm %s802_s1, 256 }
   0x4   :  { %s29_s19 = sshll.u32 %s653_s18, 4  ;;  %p536_p0 = scmp.ne.s32.totalorder %s802_s1, %s535_s22  ;;  %s30_s19 = int_to_ptr.vmem [resolvable:$true] %s29_s19 }
   0x5   :  { %p539_p1 = scmp.lt.u32.totalorder %s535_s22, %s802_s1 }
   0x7   :  { %p541_p2 = pnand %p539_p1, %p536_p0 }
   0x9   :  { %544 = shalt.err (!%p541_p2)
}
   0xa   :  { %s545_s27 = scalar_lea.vmem %s30_s19, 256  ;;  %p550_p4 = scmp.lt.s32.totalorder %s30_s19, %s30_s19 }
   0xb   :  { %p546_p3 = scmp.ne.s32.totalorder %s30_s19, %s545_s27  ;;  %p551_p5 = scmp.lt.s32.totalorder %s545_s27, %s545_s27 }
   0xd   :  { %p552_p6 = por %p551_p5, %p550_p4 }
   0xf   :  { %p553_p7 = pnand %p552_p6, %p546_p3 }
  0x11   :  { %556 = shalt.err (!%p553_p7)
}
  0x12   :  { %s654_s28 = smov 64   ;;  %s655_s29 = smov 4  }
  0x13   :  { %35 = dma.hbm_to_vmem [thread:$0]  %s802_s1, 256, %s30_s19, [#allocation6], %s654_s28, %s654_s28, %s655_s29  }
  0x14   :  { %s656_s7 = smov [#allocation2]   ;;  %s657_s9 = smov [#allocation7]  }
  0x15   :  { %s20_s8 = sshll.u32 %s656_s7, 4  ;;  %s41_s10 = sshll.u32 %s657_s9, 4  ;;  %s21_s8 = int_to_ptr.vmem [resolvable:$true] %s20_s8  ;;  %s42_s10 = int_to_ptr.vmem [resolvable:$true] %s41_s10 }
  0x16   :  { %s557_s13 = scalar_lea.hbm %s801_s0, 128 }
  0x17   :  { %p558_p8 = scmp.ne.s32.totalorder %s801_s0, %s557_s13  ;;  %p561_p9 = scmp.lt.u32.totalorder %s557_s13, %s801_s0 }
  0x19   :  { %p563_p10 = pnand %p561_p9, %p558_p8 }
  0x1b   :  { %566 = shalt.err (!%p563_p10)
}
  0x1c   :  { %s567_s1 = scalar_lea.vmem %s21_s8, 128  ;;  %p572_p12 = scmp.lt.s32.totalorder %s21_s8, %s21_s8 }
  0x1d   :  { %p568_p11 = scmp.ne.s32.totalorder %s21_s8, %s567_s1  ;;  %p573_p13 = scmp.lt.s32.totalorder %s567_s1, %s567_s1 }
  0x1f   :  { %p574_p0 = por %p573_p13, %p572_p12 }
  0x21   :  { %p575_p1 = pnand %p574_p0, %p568_p11 }
  0x23   :  { %578 = shalt.err (!%p575_p1)
}
  0x24   :  { %23 = dma.hbm_to_vmem [thread:$0]  %s801_s0, 128, %s21_s8, [#allocation3]  }
  0x25   :  { %s579_s22 = scalar_lea.hbm %s803_s2, 1024 }
  0x26   :  { %p580_p2 = scmp.ne.s32.totalorder %s803_s2, %s579_s22  ;;  %p583_p3 = scmp.lt.u32.totalorder %s579_s22, %s803_s2 }
  0x28   :  { %p585_p4 = pnand %p583_p3, %p580_p2 }
  0x2a   :  { %588 = shalt.err (!%p585_p4)
}
  0x2b   :  { %s589_s27 = scalar_lea.vmem %s42_s10, 1024  ;;  %p594_p6 = scmp.lt.s32.totalorder %s42_s10, %s42_s10 }
  0x2c   :  { %p590_p5 = scmp.ne.s32.totalorder %s42_s10, %s589_s27  ;;  %p595_p7 = scmp.lt.s32.totalorder %s589_s27, %s589_s27 }
  0x2e   :  { %p596_p8 = por %p595_p7, %p594_p6 }
  0x30   :  { %p597_p9 = pnand %p596_p8, %p590_p5 }
  0x32   :  { %600 = shalt.err (!%p597_p9)
}
  0x33   :  { %47 = dma.hbm_to_vmem [thread:$0]  %s803_s2, 1024, %s42_s10, [#allocation6], %s654_s28, %s654_s28, %s655_s29  }
  0x34   :  { %s658_s6 = smov [#allocation8]   ;;  %s601_s11 = scalar_lea.hbm %s804_s3, 1024 }
  0x35   :  { %s53_s7 = sshll.u32 %s658_s6, 4  ;;  %p602_p10 = scmp.ne.s32.totalorder %s804_s3, %s601_s11  ;;  %s54_s7 = int_to_ptr.vmem [resolvable:$true] %s53_s7 }
  0x36   :  { %p605_p11 = scmp.lt.u32.totalorder %s601_s11, %s804_s3 }
  0x38   :  { %p607_p12 = pnand %p605_p11, %p602_p10 }
  0x3a   :  { %610 = shalt.err (!%p607_p12)
}
  0x3b   :  { %s611_s16 = scalar_lea.vmem %s54_s7, 1024  ;;  %p616_p0 = scmp.lt.s32.totalorder %s54_s7, %s54_s7 }
  0x3c   :  { %p612_p13 = scmp.ne.s32.totalorder %s54_s7, %s611_s16  ;;  %p617_p1 = scmp.lt.s32.totalorder %s611_s16, %s611_s16 }
  0x3e   :  { %p618_p2 = por %p617_p1, %p616_p0 }
  0x40   :  { %p619_p3 = pnand %p618_p2, %p612_p13 }
  0x42   :  { %622 = shalt.err (!%p619_p3)
}
  0x43   :  { %59 = dma.hbm_to_vmem [thread:$0]  %s804_s3, 1024, %s54_s7, [#allocation9], %s654_s28, %s654_s28, %s655_s29  }
  0x44   :  { %645 = dma.done.wait [#allocation3], 128  }
  0x45   :  { %646 = vsyncadd [#allocation3], 4294967168 }
  0x46   :  { %647 = dma.done.wait [#allocation6], 1280  }
  0x47   :  { %648 = vsyncadd [#allocation6], 4294966016 }
  0x48   :  { %649 = dma.done.wait [#allocation9], 1024  }
  0x49   :  { %650 = vsyncadd [#allocation9], 4294966272  ;;  %v659_v0 = vmov 0.0   ;;  %vm105_vm0 = vcmask 1045504   ;;  %vm660_vm1 = vmmov 0   ;;  %vm106_vm2 = vcmask 1046528  }
  0x4a   :  { %457 = vmatprep.subr.bf16.mxu0 %v659_v0  ;;  %465 = vmatprep.subr.bf16.mxu1 %v659_v0  ;;  %v661_v1 = vmov 65535   ;;  %v515_v3 = vld [vmem:[#allocation5] sm:$0xff]   ;;  %v516_v5 = vld [vmem:[#allocation5 + $0x8] sm:$0x7f]   ;;  %v75_v6 = vld [vmem:[#allocation2] sm:$0xff]  ;;  %vm101_vm3 = vcmask 236544  }
  0x4b   :  { %461 = vmatprep.mubr.msk.bf16.mxu0 %vm660_vm1, %v659_v0  ;;  %481 = vmatprep.mubr.msk.bf16.mxu1 %vm660_vm1, %v659_v0  ;;  %v107_v2 = vsel %vm105_vm0, 4294967295, %v661_v1  ;;  %v517_v8 = vld [vmem:[#allocation7] sm:$0xff]   ;;  %v76_v9 = vpack.c.bf16 %v75_v6, %v75_v6  ;;  %v518_v10 = vld [vmem:[#allocation7 + $0x8] sm:$0xff]   ;;  %v519_v11 = vld [vmem:[#allocation7 + $0x10] sm:$0xff]   ;;  %s662_s23 = smov [#allocation10]  }
  0x4c   :  { %v108_v4 = vsel %vm106_vm2, %v107_v2, 0  ;;  %458 = vmatpush3.bf16.msra.mxu0 %v515_v3  ;;  %466 = vmatpush3.bf16.msra.mxu1 %v517_v8  ;;  %v520_v12 = vld [vmem:[#allocation7 + $0x18] sm:$0xff]   ;;  %v521_v13 = vld [vmem:[#allocation7 + $0x20] sm:$0xff]   ;;  %v522_v14 = vld [vmem:[#allocation7 + $0x28] sm:$0xff]   ;;  %s401_s24 = sshll.u32 %s662_s23, 4  ;;  %s402_s24 = int_to_ptr.vmem [resolvable:$true] %s401_s24 }
  0x4d   :  { %459 = vmatprep.subr.bf16.mxu0 %v659_v0  ;;  %v110_v7 = vand.u32 %v516_v5, %v108_v4  ;;  %467 = vmatprep.subr.bf16.mxu1 %v659_v0  ;;  %v523_v15 = vld [vmem:[#allocation7 + $0x30] sm:$0xff]   ;;  %v524_v16 = vld [vmem:[#allocation7 + $0x38] sm:$0xff]   ;;  %v525_v17 = vld [vmem:[#allocation8] sm:$0xff]   ;;  %s623_s25 = scalar_lea.vmem %s402_s24, 128  ;;  %p628_p5 = scmp.lt.s32.totalorder %s402_s24, %s402_s24 }
  0x4e   :  { %v526_v18 = vld [vmem:[#allocation8 + $0x8] sm:$0xff]   ;;  %v527_v19 = vld [vmem:[#allocation8 + $0x10] sm:$0xff]   ;;  %v528_v20 = vld [vmem:[#allocation8 + $0x18] sm:$0xff]   ;;  %p624_p4 = scmp.ne.s32.totalorder %s402_s24, %s623_s25  ;;  %p629_p6 = scmp.lt.s32.totalorder %s623_s25, %s623_s25 }
  0x4f   :  { %v529_v21 = vld [vmem:[#allocation8 + $0x20] sm:$0xff]   ;;  %v530_v22 = vld [vmem:[#allocation8 + $0x28] sm:$0xff]   ;;  %v531_v31 = vld [vmem:[#allocation8 + $0x30] sm:$0xff]  }
  0x50   :  { %460 = vmatpush3.bf16.msra.mxu0 %v110_v7  ;;  %468 = vmatpush3.bf16.msra.mxu1 %v518_v10  ;;  %v412_v23 = vld [vmem:[%s805_s4] ss:$0 sm:$0xff]  ;;  %v532_v32 = vld [vmem:[#allocation8 + $0x38] sm:$0xff]   ;;  %v416_v33 = vld [vmem:[%s805_s4 + $0x1] ss:$0 sm:$0xff]  ;;  %p630_p7 = por %p629_p6, %p628_p5 }
  0x51   :  { %485 = vmatprep.subr.bf16.mxu0 %v659_v0  ;;  %469 = vmatprep.subr.bf16.mxu1 %v659_v0  ;;  %v425_v41 = vld [vmem:[%s805_s4 + $0x2] ss:$0 sm:$0xff]  ;;  %v434_v55 = vld [vmem:[%s805_s4 + $0x3] ss:$0 sm:$0xff]  ;;  %v435_v57 = vld [vmem:[%s805_s4 + $0x4] ss:$0 sm:$0xff] }
  0x52   :  { %p631_p8 = pnand %p630_p7, %p624_p4 }
  0x53   :  { %462 = vmatmul.mubr.msk.bf16.vlgmr.msra.gmra.mrb[0].mxu0 %vm101_vm3, %v76_v9 }
  0x54   :  { %501 = vmatprep.mubr.msk.bf16.mxu0 %vm660_vm1, %v659_v0  ;;  %470 = vmatpush3.bf16.msra.mxu1 %v519_v11 }
  0x55   :  { %471 = vmatprep.subr.bf16.mxu1 %v659_v0  ;;  %486 = vmatpush3.bf16.msra.mxu0 %v525_v17 }
  0x56   :  { %487 = vmatprep.subr.bf16.mxu0 %v659_v0 }
  0x58   :  { %472 = vmatpush3.bf16.msra.mxu1 %v520_v12 }
  0x59   :  { %473 = vmatprep.subr.bf16.mxu1 %v659_v0  ;;  %488 = vmatpush3.bf16.msra.mxu0 %v526_v18 }
  0x5a   :  { %489 = vmatprep.subr.bf16.mxu0 %v659_v0 }
  0x5c   :  { %474 = vmatpush3.bf16.msra.mxu1 %v521_v13 }
  0x5d   :  { %475 = vmatprep.subr.bf16.mxu1 %v659_v0  ;;  %490 = vmatpush3.bf16.msra.mxu0 %v527_v19 }
  0x5e   :  { %491 = vmatprep.subr.bf16.mxu0 %v659_v0 }
  0x60   :  { %476 = vmatpush3.bf16.msra.mxu1 %v522_v14 }
  0x61   :  { %477 = vmatprep.subr.bf16.mxu1 %v659_v0  ;;  %492 = vmatpush3.bf16.msra.mxu0 %v528_v20 }
  0x62   :  { %493 = vmatprep.subr.bf16.mxu0 %v659_v0 }
  0x64   :  { %478 = vmatpush3.bf16.msra.mxu1 %v523_v15 }
  0x65   :  { %479 = vmatprep.subr.bf16.mxu1 %v659_v0  ;;  %494 = vmatpush3.bf16.msra.mxu0 %v529_v21 }
  0x66   :  { %495 = vmatprep.subr.bf16.mxu0 %v659_v0 }
  0x68   :  { %480 = vmatpush3.bf16.msra.mxu1 %v524_v16 }
  0x69   :  { %496 = vmatpush3.bf16.msra.mxu0 %v530_v22 }
  0x6a   :  { %497 = vmatprep.subr.bf16.mxu0 %v659_v0 }
  0x6d   :  { %498 = vmatpush3.bf16.msra.mxu0 %v531_v31 }
  0x6e   :  { %499 = vmatprep.subr.bf16.mxu0 %v659_v0 }
  0x71   :  { %500 = vmatpush3.bf16.msra.mxu0 %v532_v32 }
 0x126   :  { %v146_v24 = vpop.f32.mrb[0].mxu0 }
 0x127   :  { %v147_v25 = vadd.f32 %v412_v23, %v146_v24  ;;  %v463_v26 = vpop.f32.mrb[1].mxu0 }
 0x128   :  { %v149_v27 = vpop.f32.mrb[2].mxu0 }
 0x129   :  { %v152_v28 = vmax.f32 %v147_v25, 0.0  ;;  %v464_v29 = vpop.f32.mrb[3].mxu0 }
 0x12b   :  { %v153_v30 = vpack.c.bf16 %v152_v28, %v152_v28 }
 0x12d   :  { %482 = vmatmul.mubr.bf16.vlgmr.msra.gmra.mrb[0].mxu1 %v153_v30 }
 0x200   :  { %v256_v34 = vpop.f32.mrb[0].mxu1 }
 0x201   :  { %v257_v35 = vadd.f32 %v416_v33, %v256_v34  ;;  %v483_v36 = vpop.f32.mrb[1].mxu1 }
 0x202   :  { %v259_v37 = vpop.f32.mrb[2].mxu1 }
 0x203   :  { %v262_v38 = vmax.f32 %v257_v35, 0.0  ;;  %v484_v39 = vpop.f32.mrb[3].mxu1 }
 0x205   :  { %v263_v40 = vpack.c.bf16 %v262_v38, %v262_v38 }
 0x207   :  { %502 = vmatmul.mubr.bf16.vlgmr.msra.gmra.mrb[4].mxu0 %v263_v40 }
 0x2da   :  { %v366_v42 = vpop.f32.mrb[4].mxu0 }
 0x2db   :  { %v367_v43 = vadd.f32 %v425_v41, %v366_v42  ;;  %v503_v44 = vpop.f32.mrb[5].mxu0 }
 0x2dc   :  { %v369_v45 = vpop.f32.mrb[6].mxu0 }
 0x2dd   :  { %372 = vadd.xlane.f32.xlu0 %v367_v43  ;;  %v504_v46 = vpop.f32.mrb[7].mxu0 }
 0x36a   :  { %v373_v47 = vpop.xlane.xlu0 %372 }
 0x36b   :  { %v375_v48 = vmul.f32 0.0078125, %v373_v47 }
 0x36d   :  { %v376_v49 = vsub.f32 %v367_v43, %v375_v48 }
 0x36f   :  { %v377_v50 = vmul.f32 %v376_v49, %v376_v49 }
 0x371   :  { %378 = vadd.xlane.f32.xlu0 %v377_v50 }
 0x3fe   :  { %v379_v51 = vpop.xlane.xlu0 %378 }
 0x3ff   :  { %v380_v52 = vmul.f32 0.0078125, %v379_v51 }
 0x401   :  { %v381_v53 = vadd.f32 1e-05, %v380_v52 }
 0x403   :  { %533 = vrsqrt.f32 %v381_v53 }
 0x40d   :  { %v534_v54 = vpop.eup %533 }
 0x40e   :  { %v383_v56 = vmul.f32 %v534_v54, %v376_v49 }
 0x410   :  { %v388_v58 = vmul.f32 %v434_v55, %v383_v56 }
 0x412   :  { %v393_v59 = vadd.f32 %v435_v57, %v388_v58 }
 0x414   :  { %394 = vst [vmem:[#allocation10] sm:$0xff] %v393_v59 }
 0x415   :  { %634 = shalt.err (!%p631_p8)
}
 0x416   :  { %s635_s0 = scalar_lea.hbm %s806_s5, 128 }
 0x417   :  { %p636_p9 = scmp.ne.s32.totalorder %s806_s5, %s635_s0  ;;  %p639_p10 = scmp.lt.u32.totalorder %s635_s0, %s806_s5 }
 0x419   :  { %p641_p11 = pnand %p639_p10, %p636_p9 }
 0x41b   :  { %644 = shalt.err (!%p641_p11)
}
 0x41c   :  { %404 = dma.vmem_to_hbm [thread:$0]  %s402_s24, 128, %s806_s5, [#allocation4]  }
 0x41d   :  { %651 = dma.done.wait [#allocation4], 128  }
 0x41e   :  { %652 = vsyncadd [#allocation4], 4294967168 }
 0x41f   :  { %408 = vsyncpa [#allocation3], 1 }
 0x420   :  { %409 = vsyncpa [#allocation6], 1 }
 0x421   :  { %410 = vsyncpa [#allocation9], 1 }
 0x422   :  { %411 = vsyncpa [#allocation4], 1 }

</bundles_post_ra>
